<compile_context>
chip_gen: v6e
topology: v6e:2x2x1
jax: 0.10.0
libtpu: 0.0.40
codegen_flags: <defaults>
</compile_context>

<pallas_src>
import functools

import jax
import jax.numpy as jnp
from jax import lax
from jax.experimental import pallas as pl
from jax.experimental.pallas import tpu as pltpu


def _round_up(x, m):
    return (x + m - 1) // m * m


# ---------------------------------------------------------------------------
# Fused kernel: one grid step == `bt` images (NHWC, channels on the 128 lanes)
# ---------------------------------------------------------------------------
def _fused_bottleneck_kernel(x_ref, w1_ref, b1_ref, w2_ref, b2_ref, w3_ref,
                             b3_ref, o_ref, h1_ref, *, stride, add_residual):
    bt, h, w, cin = x_ref.shape
    chp = w1_ref.shape[1]          # hidden channels, padded to a multiple of 128
    _, ho, wo, cout = o_ref.shape
    span_h = (ho - 1) * stride + 1

    # ---- stage 1: 1x1 expand (MXU, bf16 x bf16 -> f32 acc) + BN + ReLU6 ----
    x2d = x_ref[...].reshape(bt * h * w, cin)                      # bf16
    h1 = jnp.dot(x2d, w1_ref[...], preferred_element_type=jnp.float32)
    h1 = jnp.clip(h1 + b1_ref[...], 0.0, 6.0)                      # f32

    # bf16 scratch with a 1-row zero halo on the outer h axis only; every
    # access along the sublane (w) axis is full width at offset 0 (aligned).
    # Halo rows are re-zeroed every grid step, so "parallel" sharding of the
    # batch-block axis across TensorCores stays correct.
    zrow = jnp.zeros((bt, 1, w, chp), jnp.bfloat16)
    h1_ref[:, 0:1, :, :] = zrow
    h1_ref[:, h + 1:h + 2, :, :] = zrow
    h1_ref[:, 1:h + 1, :, :] = h1.astype(jnp.bfloat16).reshape(bt, h, w, chp)

    # ---- stage 2: 3x3 depthwise (VPU f32 accumulation, XLU rolls) ----------
    w2 = w2_ref[...]                                               # (9, chp) f32
    acc_l = jnp.zeros((bt, ho, w, chp), jnp.float32)               # kw = 0 taps
    acc_c = jnp.zeros((bt, ho, w, chp), jnp.float32)               # kw = 1 taps
    acc_r = jnp.zeros((bt, ho, w, chp), jnp.float32)               # kw = 2 taps
    for kh in range(3):
        rows = h1_ref[:, kh:kh + span_h, :, :]                     # aligned load
        if stride > 1:
            # TODO(synk): swap for a ref-level strided read
            # (h1_ref[:, pl.ds(kh, ho, stride=stride)]) once verified on all
            # target generations; decimating the loaded value along this outer
            # axis is plain vreg selection (no retile).
            rows = lax.slice(rows, (0, 0, 0, 0), (bt, span_h, w, chp),
                             (1, stride, 1, 1))                    # (bt,ho,w,chp)
        rows = rows.astype(jnp.float32)
        acc_l = acc_l + rows * w2[3 * kh + 0]
        acc_c = acc_c + rows * w2[3 * kh + 1]
        acc_r = acc_r + rows * w2[3 * kh + 2]

    # kw = -1 / +1 taps: rotate the per-kw accumulators along the sublane (w)
    # axis on the XLU and zero the single wrapped column (the 3x3 zero halo).
    col = lax.broadcasted_iota(jnp.int32, (bt, ho, w, chp), 2)
    left = pltpu.roll(acc_l, shift=1, axis=2)
    left = jnp.where(col == 0, 0.0, left)
    right = pltpu.roll(acc_r, shift=w - 1, axis=2)                 # == shift -1
    right = jnp.where(col == w - 1, 0.0, right)
    h2 = acc_c + left + right                                      # (bt,ho,w,chp)
    if stride > 1:
        h2 = lax.slice(h2, (0, 0, 0, 0), (bt, ho, w, chp), (1, 1, stride, 1))
    h2 = jnp.clip(h2 + b2_ref[...].reshape(1, 1, 1, chp), 0.0, 6.0)

    # ---- stage 3: 1x1 project (MXU) + BN (+ fused residual) ----------------
    h2b = h2.astype(jnp.bfloat16).reshape(bt * ho * wo, chp)
    out = jnp.dot(h2b, w3_ref[...], preferred_element_type=jnp.float32)
    out = out + b3_ref[...]
    if add_residual:
        # TODO(synk): the skip connection adds the bf16-quantized input (f32 in
        # the PyTorch module); carry an f32 copy of x if exact parity of the
        # residual path is required.
        out = out + x2d.astype(jnp.float32)
    o_ref[...] = out.reshape(bt, ho, wo, cout).astype(o_ref.dtype)


def _weight_spec(shape):
    return pl.BlockSpec(shape, lambda i: (0, 0))   # resident across the grid


def _pick_batch_tile(n, hw, target_rows=256):
    """Largest divisor of n giving roughly >= target_rows MXU rows per step."""
    bt = max(1, min(n, max(1, target_rows // max(hw, 1))))
    while n % bt:
        bt -= 1
    return bt


@functools.lru_cache(maxsize=None)
def _vmem_limit_bytes():
    cap = 64 * 1024 * 1024
    try:
        cap = int(getattr(pltpu.get_tpu_info(), "vmem_capacity_bytes", cap))
    except Exception:                      # conservative fallback
        pass
    # ~3/4 of physical VMEM: ~48 MiB on v7x (64 MiB), ~96 MiB on v5e/v6e.
    return int(min(112 * 1024 * 1024, max(32 * 1024 * 1024, (cap * 3) // 4)))


# ---------------------------------------------------------------------------
# Forward pass
# ---------------------------------------------------------------------------
@functools.partial(jax.jit,
                   static_argnames=("stride", "in_channels", "out_channels"))
def linear_bottleneck_forward(x_nchw, kparams, *, stride, in_channels,
                              out_channels):
    n, cin, h, w = x_nchw.shape
    assert cin == in_channels
    chp = kparams["w1"].shape[1]
    cout = kparams["w3"].shape[1]
    assert cout == out_channels
    ho = (h + 2 - 3) // stride + 1
    wo = (w + 2 - 3) // stride + 1
    add_residual = (stride == 1 and in_channels == out_channels)

    bt = _pick_batch_tile(n, h * w)
    grid = (n // bt,)

    # NCHW -> NHWC (channels on lanes); bf16 activations for the MXU + HBM.
    # TODO(synk): accept/emit NHWC bf16 at the module boundary to drop the two
    # layout transposes; they only touch the small cin/cout tensors, never the
    # expanded intermediate (which never leaves VMEM).
    x = jnp.transpose(x_nchw, (0, 2, 3, 1)).astype(jnp.bfloat16)

    flops = (2 * n * h * w * cin * chp            # expand matmul
             + 18 * n * ho * w * chp              # depthwise 3x3
             + 2 * n * ho * wo * chp * cout)      # project matmul
    bytes_accessed = (x.size * 2 + n * ho * wo * cout * 2
                      + kparams["w1"].size * 2 + kparams["w3"].size * 2
                      + (kparams["b1"].size + kparams["w2"].size
                         + kparams["b2"].size + kparams["b3"].size) * 4)

    kernel = functools.partial(_fused_bottleneck_kernel, stride=stride,
                               add_residual=add_residual)

    out_nhwc = pl.pallas_call(
        kernel,
        out_shape=jax.ShapeDtypeStruct((n, ho, wo, cout), jnp.bfloat16),
        grid_spec=pltpu.PrefetchScalarGridSpec(
            num_scalar_prefetch=0,
            grid=grid,
            in_specs=[
                pl.BlockSpec((bt, h, w, cin), lambda i: (i, 0, 0, 0)),
                _weight_spec((cin, chp)),     # w1 (bf16)
                _weight_spec((1, chp)),       # b1 (f32)
                _weight_spec((9, chp)),       # w2 (f32)
                _weight_spec((1, chp)),       # b2 (f32)
                _weight_spec((chp, cout)),    # w3 (bf16)
                _weight_spec((1, cout)),      # b3 (f32)
            ],
            out_specs=pl.BlockSpec((bt, ho, wo, cout), lambda i: (i, 0, 0, 0)),
            scratch_shapes=[pltpu.VMEM((bt, h + 2, w, chp), jnp.bfloat16)],
        ),
        compiler_params=pltpu.CompilerParams(
            dimension_semantics=("parallel",),        # megacore split on v7x
            vmem_limit_bytes=_vmem_limit_bytes(),
        ),
        cost_estimate=pl.CostEstimate(flops=flops, transcendentals=0,
                                      bytes_accessed=bytes_accessed),
    )(x, kparams["w1"], kparams["b1"], kparams["w2"], kparams["b2"],
      kparams["w3"], kparams["b3"])

    # Module contract is NCHW f32.
    return jnp.transpose(out_nhwc, (0, 3, 1, 2)).astype(jnp.float32)


# ---------------------------------------------------------------------------
# Parameters (deterministic; BatchNorm folded in inference mode)
# ---------------------------------------------------------------------------
def _fold_bn(gamma, beta, mean, var, eps=1e-5):
    scale = gamma / jnp.sqrt(var + eps)
    shift = beta - mean * scale
    return scale, shift


def init_params(key, in_channels, out_channels, t):
    """Folded f32 parameters (used directly by the pure-JAX reference)."""
    ch = in_channels * t
    ks = jax.random.split(key, 18)

    def u(k, shape, lo, hi):
        return jax.random.uniform(k, shape, jnp.float32, lo, hi)

    w1 = u(ks[0], (in_channels, ch), -0.3, 0.3)
    b1 = u(ks[1], (ch,), -0.1, 0.1)
    s1, sh1 = _fold_bn(u(ks[2], (ch,), 0.5, 1.5), u(ks[3], (ch,), -0.1, 0.1),
                       u(ks[4], (ch,), -0.1, 0.1), u(ks[5], (ch,), 0.5, 1.5))
    w2 = u(ks[6], (3, 3, ch), -0.3, 0.3)
    b2 = u(ks[7], (ch,), -0.1, 0.1)
    s2, sh2 = _fold_bn(u(ks[8], (ch,), 0.5, 1.5), u(ks[9], (ch,), -0.1, 0.1),
                       u(ks[10], (ch,), -0.1, 0.1), u(ks[11], (ch,), 0.5, 1.5))
    w3 = u(ks[12], (ch, out_channels), -0.3, 0.3)
    b3 = u(ks[13], (out_channels,), -0.1, 0.1)
    s3, sh3 = _fold_bn(u(ks[14], (out_channels,), 0.5, 1.5),
                       u(ks[15], (out_channels,), -0.1, 0.1),
                       u(ks[16], (out_channels,), -0.1, 0.1),
                       u(ks[17], (out_channels,), 0.5, 1.5))
    return {
        "w1": w1 * s1[None, :], "b1": b1 * s1 + sh1,
        "w2_hwc": w2 * s2[None, None, :], "b2": b2 * s2 + sh2,
        "w3": w3 * s3[None, :], "b3": b3 * s3 + sh3,
    }


def prepare_kernel_params(p):
    """Pad the hidden axis to a multiple of 128 lanes; bf16 MXU operands.

    The padded hidden channels stay inert only because w1/b1/w2/b2 and the
    padded rows of w3 are zero-padded (ReLU6(0 + 0) == 0); jnp.pad guarantees
    that here.
    """
    ch = p["w1"].shape[1]
    cout = p["w3"].shape[1]
    chp = _round_up(ch, 128)
    pad = chp - ch
    return {
        "w1": jnp.pad(p["w1"], ((0, 0), (0, pad))).astype(jnp.bfloat16),
        "b1": jnp.pad(p["b1"], (0, pad)).reshape(1, chp).astype(jnp.float32),
        "w2": jnp.pad(p["w2_hwc"].reshape(9, ch),
                      ((0, 0), (0, pad))).astype(jnp.float32),
        "b2": jnp.pad(p["b2"], (0, pad)).reshape(1, chp).astype(jnp.float32),
        "w3": jnp.pad(p["w3"], ((0, pad), (0, 0))).astype(jnp.bfloat16),
        "b3": p["b3"].reshape(1, cout).astype(jnp.float32),
    }


# ---------------------------------------------------------------------------
# Pure-JAX reference (same bf16-operand / bf16-intermediate / f32-accumulate
# scheme as the kernel)
# ---------------------------------------------------------------------------
def reference(x_nchw, p, *, stride, in_channels, out_channels):
    n, cin, h, w = x_nchw.shape
    ch = p["w1"].shape[1]
    cout = p["w3"].shape[1]
    x = jnp.transpose(x_nchw, (0, 2, 3, 1))
    xb = x.astype(jnp.bfloat16)

    h1 = jnp.dot(xb.reshape(n * h * w, cin), p["w1"].astype(jnp.bfloat16),
                 preferred_element_type=jnp.float32)
    h1 = jnp.clip(h1 + p["b1"], 0.0, 6.0).reshape(n, h, w, ch)
    # Mirror the kernel's bf16 storage of the expanded intermediate.
    h1 = h1.astype(jnp.bfloat16).astype(jnp.float32)

    dw = p["w2_hwc"][:, :, None, :]                     # HWIO with I=1
    h2 = lax.conv_general_dilated(
        h1, dw, window_strides=(stride, stride), padding=((1, 1), (1, 1)),
        dimension_numbers=("NHWC", "HWIO", "NHWC"),
        feature_group_count=ch, precision=lax.Precision.HIGHEST)
    h2 = jnp.clip(h2 + p["b2"], 0.0, 6.0)
    ho, wo = h2.shape[1], h2.shape[2]

    out = jnp.dot(h2.astype(jnp.bfloat16).reshape(n * ho * wo, ch),
                  p["w3"].astype(jnp.bfloat16),
                  preferred_element_type=jnp.float32) + p["b3"]
    out = out.reshape(n, ho, wo, cout)
    if stride == 1 and in_channels == out_channels:
        out = out + xb.astype(jnp.float32)
    return jnp.transpose(out, (0, 3, 1, 2))


# ---------------------------------------------------------------------------
if __name__ == "__main__":
    N, H, W, T = 2, 8, 8, 6
    key = jax.random.PRNGKey(0)

    for (cin, cout, stride) in [(8, 8, 1),      # residual path
                                (8, 16, 2)]:    # strided, no residual
        kx, kp, key = jax.random.split(key, 3)
        x = jax.random.normal(kx, (N, cin, H, W), jnp.float32)
        params = init_params(kp, cin, cout, T)
        kparams = prepare_kernel_params(params)

        out = linear_bottleneck_forward(
            x, kparams, stride=stride, in_channels=cin, out_channels=cout)
        out = jax.block_until_ready(out)

        ref = reference(x, params, stride=stride, in_channels=cin,
                        out_channels=cout)
        ho = (H + 2 - 3) // stride + 1
        assert out.shape == ref.shape == (N, cout, ho, ho)
        assert jnp.allclose(out, ref, atol=3e-2, rtol=3e-2), (
            f"mismatch vs reference (cin={cin}, cout={cout}, stride={stride})")

    print("KERNEL_OK")
</pallas_src>

<mosaic_0001>
module attributes {stable_mosaic.version = 11 : i64} {
  func.func @_fused_bottleneck_kernel(%arg0: i32, %arg1: memref<2x8x8x8xbf16, #tpu.memory_space<vmem>>, %arg2: memref<8x128xbf16, #tpu.memory_space<vmem>>, %arg3: memref<1x128xf32, #tpu.memory_space<vmem>>, %arg4: memref<9x128xf32, #tpu.memory_space<vmem>>, %arg5: memref<1x128xf32, #tpu.memory_space<vmem>>, %arg6: memref<128x8xbf16, #tpu.memory_space<vmem>>, %arg7: memref<1x8xf32, #tpu.memory_space<vmem>>, %arg8: memref<2x8x8x8xbf16, #tpu.memory_space<vmem>>, %arg9: memref<2x10x8x128xbf16, #tpu.memory_space<vmem>>) attributes {dimension_semantics = [#tpu.dimension_semantics<parallel>], iteration_bounds = array<i64: 1>, scalar_prefetch = 0 : i64, scratch_operands = 1 : i64, tpu.core_type = #tpu.core_type<tc>, window_params = [{transform_indices = @transform_0, window_bounds = array<i64: 2, 8, 8, 8>}, {pipeline_mode = #tpu.pipeline_mode<synchronous>, transform_indices = @transform_1, window_bounds = array<i64: 8, 128>}, {pipeline_mode = #tpu.pipeline_mode<synchronous>, transform_indices = @transform_2, window_bounds = array<i64: 1, 128>}, {pipeline_mode = #tpu.pipeline_mode<synchronous>, transform_indices = @transform_3, window_bounds = array<i64: 9, 128>}, {pipeline_mode = #tpu.pipeline_mode<synchronous>, transform_indices = @transform_4, window_bounds = array<i64: 1, 128>}, {pipeline_mode = #tpu.pipeline_mode<synchronous>, transform_indices = @transform_5, window_bounds = array<i64: 128, 8>}, {pipeline_mode = #tpu.pipeline_mode<synchronous>, transform_indices = @transform_6, window_bounds = array<i64: 1, 8>}, {transform_indices = @transform_7, window_bounds = array<i64: 2, 8, 8, 8>}]} {
    %c0 = arith.constant 0 : index
    %c0_0 = arith.constant 0 : index
    %c0_1 = arith.constant 0 : index
    %c0_2 = arith.constant 0 : index
    %0 = vector.load %arg1[%c0, %c0_0, %c0_1, %c0_2] : memref<2x8x8x8xbf16, #tpu.memory_space<vmem>>, vector<2x8x8x8xbf16>
    %1 = vector.shape_cast %0 : vector<2x8x8x8xbf16> to vector<128x8xbf16>
    %c0_3 = arith.constant 0 : index
    %c0_4 = arith.constant 0 : index
    %2 = vector.load %arg2[%c0_3, %c0_4] : memref<8x128xbf16, #tpu.memory_space<vmem>>, vector<8x128xbf16>
    %cst = arith.constant dense<0.000000e+00> : vector<128x128xf32>
    %3 = tpu.matmul %1, %2, %cst {dimension_numbers = #tpu.dot_dimension_numbers<[1], [0], [0], [1], [0, 0, 1, 1], [], []>} : vector<128x8xbf16>, vector<8x128xbf16>, vector<128x128xf32> -> vector<128x128xf32>
    %c0_5 = arith.constant 0 : index
    %c0_6 = arith.constant 0 : index
    %4 = vector.load %arg3[%c0_5, %c0_6] : memref<1x128xf32, #tpu.memory_space<vmem>>, vector<1x128xf32>
    %5 = vector.broadcast %4 : vector<1x128xf32> to vector<128x128xf32>
    %6 = arith.addf %3, %5 : vector<128x128xf32>
    %cst_7 = arith.constant 0.000000e+00 : f32
    %cst_8 = arith.constant 6.000000e+00 : f32
    %7 = vector.broadcast %cst_7 : f32 to vector<128x128xf32>
    %8 = arith.maximumf %7, %6 : vector<128x128xf32>
    %9 = vector.broadcast %cst_8 : f32 to vector<128x128xf32>
    %10 = arith.minimumf %9, %8 : vector<128x128xf32>
    %cst_9 = arith.constant 0.000000e+00 : bf16
    %11 = vector.broadcast %cst_9 : bf16 to vector<2x1x8x128xbf16>
    %c0_10 = arith.constant 0 : index
    %c0_11 = arith.constant 0 : index
    %c0_12 = arith.constant 0 : index
    %c0_13 = arith.constant 0 : index
    %12 = vector.load %arg9[%c0_10, %c0_11, %c0_12, %c0_13] : memref<2x10x8x128xbf16, #tpu.memory_space<vmem>>, vector<2x1x8x128xbf16>
    tpu.vector_store %arg9[%c0_10, %c0_11, %c0_12, %c0_13], %11 {strides = array<i32>} : memref<2x10x8x128xbf16, #tpu.memory_space<vmem>>, vector<2x1x8x128xbf16>,
    %c0_14 = arith.constant 0 : index
    %c9 = arith.constant 9 : index
    %c0_15 = arith.constant 0 : index
    %c0_16 = arith.constant 0 : index
    %13 = vector.load %arg9[%c0_14, %c9, %c0_15, %c0_16] : memref<2x10x8x128xbf16, #tpu.memory_space<vmem>>, vector<2x1x8x128xbf16>
    tpu.vector_store %arg9[%c0_14, %c9, %c0_15, %c0_16], %11 {strides = array<i32>} : memref<2x10x8x128xbf16, #tpu.memory_space<vmem>>, vector<2x1x8x128xbf16>,
    %14 = arith.truncf %10 : vector<128x128xf32> to vector<128x128xbf16>
    %15 = vector.shape_cast %14 : vector<128x128xbf16> to vector<2x8x8x128xbf16>
    %c0_17 = arith.constant 0 : index
    %c1 = arith.constant 1 : index
    %c0_18 = arith.constant 0 : index
    %c0_19 = arith.constant 0 : index
    %16 = vector.load %arg9[%c0_17, %c1, %c0_18, %c0_19] : memref<2x10x8x128xbf16, #tpu.memory_space<vmem>>, vector<2x8x8x128xbf16>
    tpu.vector_store %arg9[%c0_17, %c1, %c0_18, %c0_19], %15 {strides = array<i32>} : memref<2x10x8x128xbf16, #tpu.memory_space<vmem>>, vector<2x8x8x128xbf16>,
    %c0_20 = arith.constant 0 : index
    %c0_21 = arith.constant 0 : index
    %17 = vector.load %arg4[%c0_20, %c0_21] : memref<9x128xf32, #tpu.memory_space<vmem>>, vector<9x128xf32>
    %cst_22 = arith.constant 0.000000e+00 : f32
    %18 = vector.broadcast %cst_22 : f32 to vector<2x8x8x128xf32>
    %cst_23 = arith.constant 0.000000e+00 : f32
    %19 = vector.broadcast %cst_23 : f32 to vector<2x8x8x128xf32>
    %cst_24 = arith.constant 0.000000e+00 : f32
    %20 = vector.broadcast %cst_24 : f32 to vector<2x8x8x128xf32>
    %c0_25 = arith.constant 0 : index
    %c0_26 = arith.constant 0 : index
    %c0_27 = arith.constant 0 : index
    %c0_28 = arith.constant 0 : index
    %21 = vector.load %arg9[%c0_25, %c0_26, %c0_27, %c0_28] : memref<2x10x8x128xbf16, #tpu.memory_space<vmem>>, vector<2x8x8x128xbf16>
    %22 = arith.extf %21 : vector<2x8x8x128xbf16> to vector<2x8x8x128xf32>
    %23 = vector.extract_strided_slice %17 {offsets = [0, 0], sizes = [1, 128], strides = [1, 1]} : vector<9x128xf32> to vector<1x128xf32>
    %24 = vector.shape_cast %23 : vector<1x128xf32> to vector<128xf32>
    %25 = vector.shape_cast %24 : vector<128xf32> to vector<1x1x1x128xf32>
    %26 = vector.broadcast %25 : vector<1x1x1x128xf32> to vector<2x8x8x128xf32>
    %27 = arith.mulf %22, %26 : vector<2x8x8x128xf32>
    %28 = arith.addf %18, %27 : vector<2x8x8x128xf32>
    %29 = vector.extract_strided_slice %17 {offsets = [1, 0], sizes = [1, 128], strides = [1, 1]} : vector<9x128xf32> to vector<1x128xf32>
    %30 = vector.shape_cast %29 : vector<1x128xf32> to vector<128xf32>
    %31 = vector.shape_cast %30 : vector<128xf32> to vector<1x1x1x128xf32>
    %32 = vector.broadcast %31 : vector<1x1x1x128xf32> to vector<2x8x8x128xf32>
    %33 = arith.mulf %22, %32 : vector<2x8x8x128xf32>
    %34 = arith.addf %19, %33 : vector<2x8x8x128xf32>
    %35 = vector.extract_strided_slice %17 {offsets = [2, 0], sizes = [1, 128], strides = [1, 1]} : vector<9x128xf32> to vector<1x128xf32>
    %36 = vector.shape_cast %35 : vector<1x128xf32> to vector<128xf32>
    %37 = vector.shape_cast %36 : vector<128xf32> to vector<1x1x1x128xf32>
    %38 = vector.broadcast %37 : vector<1x1x1x128xf32> to vector<2x8x8x128xf32>
    %39 = arith.mulf %22, %38 : vector<2x8x8x128xf32>
    %40 = arith.addf %20, %39 : vector<2x8x8x128xf32>
    %c0_29 = arith.constant 0 : index
    %c1_30 = arith.constant 1 : index
    %c0_31 = arith.constant 0 : index
    %c0_32 = arith.constant 0 : index
    %41 = vector.load %arg9[%c0_29, %c1_30, %c0_31, %c0_32] : memref<2x10x8x128xbf16, #tpu.memory_space<vmem>>, vector<2x8x8x128xbf16>
    %42 = arith.extf %41 : vector<2x8x8x128xbf16> to vector<2x8x8x128xf32>
    %43 = vector.extract_strided_slice %17 {offsets = [3, 0], sizes = [1, 128], strides = [1, 1]} : vector<9x128xf32> to vector<1x128xf32>
    %44 = vector.shape_cast %43 : vector<1x128xf32> to vector<128xf32>
    %45 = vector.shape_cast %44 : vector<128xf32> to vector<1x1x1x128xf32>
    %46 = vector.broadcast %45 : vector<1x1x1x128xf32> to vector<2x8x8x128xf32>
    %47 = arith.mulf %42, %46 : vector<2x8x8x128xf32>
    %48 = arith.addf %28, %47 : vector<2x8x8x128xf32>
    %49 = vector.extract_strided_slice %17 {offsets = [4, 0], sizes = [1, 128], strides = [1, 1]} : vector<9x128xf32> to vector<1x128xf32>
    %50 = vector.shape_cast %49 : vector<1x128xf32> to vector<128xf32>
    %51 = vector.shape_cast %50 : vector<128xf32> to vector<1x1x1x128xf32>
    %52 = vector.broadcast %51 : vector<1x1x1x128xf32> to vector<2x8x8x128xf32>
    %53 = arith.mulf %42, %52 : vector<2x8x8x128xf32>
    %54 = arith.addf %34, %53 : vector<2x8x8x128xf32>
    %55 = vector.extract_strided_slice %17 {offsets = [5, 0], sizes = [1, 128], strides = [1, 1]} : vector<9x128xf32> to vector<1x128xf32>
    %56 = vector.shape_cast %55 : vector<1x128xf32> to vector<128xf32>
    %57 = vector.shape_cast %56 : vector<128xf32> to vector<1x1x1x128xf32>
    %58 = vector.broadcast %57 : vector<1x1x1x128xf32> to vector<2x8x8x128xf32>
    %59 = arith.mulf %42, %58 : vector<2x8x8x128xf32>
    %60 = arith.addf %40, %59 : vector<2x8x8x128xf32>
    %c0_33 = arith.constant 0 : index
    %c2 = arith.constant 2 : index
    %c0_34 = arith.constant 0 : index
    %c0_35 = arith.constant 0 : index
    %61 = vector.load %arg9[%c0_33, %c2, %c0_34, %c0_35] : memref<2x10x8x128xbf16, #tpu.memory_space<vmem>>, vector<2x8x8x128xbf16>
    %62 = arith.extf %61 : vector<2x8x8x128xbf16> to vector<2x8x8x128xf32>
    %63 = vector.extract_strided_slice %17 {offsets = [6, 0], sizes = [1, 128], strides = [1, 1]} : vector<9x128xf32> to vector<1x128xf32>
    %64 = vector.shape_cast %63 : vector<1x128xf32> to vector<128xf32>
    %65 = vector.shape_cast %64 : vector<128xf32> to vector<1x1x1x128xf32>
    %66 = vector.broadcast %65 : vector<1x1x1x128xf32> to vector<2x8x8x128xf32>
    %67 = arith.mulf %62, %66 : vector<2x8x8x128xf32>
    %68 = arith.addf %48, %67 : vector<2x8x8x128xf32>
    %69 = vector.extract_strided_slice %17 {offsets = [7, 0], sizes = [1, 128], strides = [1, 1]} : vector<9x128xf32> to vector<1x128xf32>
    %70 = vector.shape_cast %69 : vector<1x128xf32> to vector<128xf32>
    %71 = vector.shape_cast %70 : vector<128xf32> to vector<1x1x1x128xf32>
    %72 = vector.broadcast %71 : vector<1x1x1x128xf32> to vector<2x8x8x128xf32>
    %73 = arith.mulf %62, %72 : vector<2x8x8x128xf32>
    %74 = arith.addf %54, %73 : vector<2x8x8x128xf32>
    %75 = vector.extract_strided_slice %17 {offsets = [8, 0], sizes = [1, 128], strides = [1, 1]} : vector<9x128xf32> to vector<1x128xf32>
    %76 = vector.shape_cast %75 : vector<1x128xf32> to vector<128xf32>
    %77 = vector.shape_cast %76 : vector<128xf32> to vector<1x1x1x128xf32>
    %78 = vector.broadcast %77 : vector<1x1x1x128xf32> to vector<2x8x8x128xf32>
    %79 = arith.mulf %62, %78 : vector<2x8x8x128xf32>
    %80 = arith.addf %60, %79 : vector<2x8x8x128xf32>
    %81 = tpu.iota {dimensions = array<i32: 2>} : vector<2x8x8x128xi32>
    %c1_i32 = arith.constant 1 : i32
    %82 = tpu.dynamic_rotate %68 by %c1_i32 dim 2 : vector<2x8x8x128xf32>, i32 -> vector<2x8x8x128xf32>
    %c0_i32 = arith.constant 0 : i32
    %83 = vector.broadcast %c0_i32 : i32 to vector<2x8x8x128xi32>
    %84 = arith.cmpi eq, %81, %83 : vector<2x8x8x128xi32>
    %cst_36 = arith.constant 0.000000e+00 : f32
    %85 = vector.broadcast %cst_36 : f32 to vector<2x8x8x128xf32>
    %86 = arith.select %84, %85, %82 : vector<2x8x8x128xi1>, vector<2x8x8x128xf32>
    %c7_i32 = arith.constant 7 : i32
    %87 = tpu.dynamic_rotate %80 by %c7_i32 dim 2 : vector<2x8x8x128xf32>, i32 -> vector<2x8x8x128xf32>
    %c7_i32_37 = arith.constant 7 : i32
    %88 = vector.broadcast %c7_i32_37 : i32 to vector<2x8x8x128xi32>
    %89 = arith.cmpi eq, %81, %88 : vector<2x8x8x128xi32>
    %cst_38 = arith.constant 0.000000e+00 : f32
    %90 = vector.broadcast %cst_38 : f32 to vector<2x8x8x128xf32>
    %91 = arith.select %89, %90, %87 : vector<2x8x8x128xi1>, vector<2x8x8x128xf32>
    %92 = arith.addf %74, %86 : vector<2x8x8x128xf32>
    %93 = arith.addf %92, %91 : vector<2x8x8x128xf32>
    %c0_39 = arith.constant 0 : index
    %c0_40 = arith.constant 0 : index
    %94 = vector.load %arg5[%c0_39, %c0_40] : memref<1x128xf32, #tpu.memory_space<vmem>>, vector<1x128xf32>
    %95 = vector.shape_cast %94 : vector<1x128xf32> to vector<1x1x1x128xf32>
    %96 = vector.broadcast %95 : vector<1x1x1x128xf32> to vector<2x8x8x128xf32>
    %97 = arith.addf %93, %96 : vector<2x8x8x128xf32>
    %cst_41 = arith.constant 0.000000e+00 : f32
    %cst_42 = arith.constant 6.000000e+00 : f32
    %98 = vector.broadcast %cst_41 : f32 to vector<2x8x8x128xf32>
    %99 = arith.maximumf %98, %97 : vector<2x8x8x128xf32>
    %100 = vector.broadcast %cst_42 : f32 to vector<2x8x8x128xf32>
    %101 = arith.minimumf %100, %99 : vector<2x8x8x128xf32>
    %102 = arith.truncf %101 : vector<2x8x8x128xf32> to vector<2x8x8x128xbf16>
    %103 = vector.shape_cast %102 : vector<2x8x8x128xbf16> to vector<128x128xbf16>
    %c0_43 = arith.constant 0 : index
    %c0_44 = arith.constant 0 : index
    %104 = vector.load %arg6[%c0_43, %c0_44] : memref<128x8xbf16, #tpu.memory_space<vmem>>, vector<128x8xbf16>
    %cst_45 = arith.constant dense<0.000000e+00> : vector<128x8xf32>
    %105 = tpu.matmul %103, %104, %cst_45 {dimension_numbers = #tpu.dot_dimension_numbers<[1], [0], [0], [1], [0, 0, 1, 1], [], []>} : vector<128x128xbf16>, vector<128x8xbf16>, vector<128x8xf32> -> vector<128x8xf32>
    %c0_46 = arith.constant 0 : index
    %c0_47 = arith.constant 0 : index
    %106 = vector.load %arg7[%c0_46, %c0_47] : memref<1x8xf32, #tpu.memory_space<vmem>>, vector<1x8xf32>
    %107 = vector.broadcast %106 : vector<1x8xf32> to vector<128x8xf32>
    %108 = arith.addf %105, %107 : vector<128x8xf32>
    %109 = arith.extf %1 : vector<128x8xbf16> to vector<128x8xf32>
    %110 = arith.addf %108, %109 : vector<128x8xf32>
    %111 = vector.shape_cast %110 : vector<128x8xf32> to vector<2x8x8x8xf32>
    %112 = arith.truncf %111 : vector<2x8x8x8xf32> to vector<2x8x8x8xbf16>
    %c0_48 = arith.constant 0 : index
    %c0_49 = arith.constant 0 : index
    %c0_50 = arith.constant 0 : index
    %c0_51 = arith.constant 0 : index
    %113 = vector.load %arg8[%c0_48, %c0_49, %c0_50, %c0_51] : memref<2x8x8x8xbf16, #tpu.memory_space<vmem>>, vector<2x8x8x8xbf16>
    tpu.vector_store %arg8[%c0_48, %c0_49, %c0_50, %c0_51], %112 {strides = array<i32>} : memref<2x8x8x8xbf16, #tpu.memory_space<vmem>>, vector<2x8x8x8xbf16>,
    return
  }
  func.func @transform_0(%arg0: i32) -> (i32, i32, i32, i32) {
    %c0_i32 = arith.constant 0 : i32
    %c0_i32_0 = arith.constant 0 : i32
    %c0_i32_1 = arith.constant 0 : i32
    %c0_i32_2 = arith.constant 0 : i32
    return %arg0, %c0_i32, %c0_i32_0, %c0_i32_1 : i32, i32, i32, i32
  }
  func.func @transform_1(%arg0: i32) -> (i32, i32) {
    %c0_i32 = arith.constant 0 : i32
    %c0_i32_0 = arith.constant 0 : i32
    %c0_i32_1 = arith.constant 0 : i32
    return %c0_i32, %c0_i32_0 : i32, i32
  }
  func.func @transform_2(%arg0: i32) -> (i32, i32) {
    %c0_i32 = arith.constant 0 : i32
    %c0_i32_0 = arith.constant 0 : i32
    %c0_i32_1 = arith.constant 0 : i32
    return %c0_i32, %c0_i32_0 : i32, i32
  }
  func.func @transform_3(%arg0: i32) -> (i32, i32) {
    %c0_i32 = arith.constant 0 : i32
    %c0_i32_0 = arith.constant 0 : i32
    %c0_i32_1 = arith.constant 0 : i32
    return %c0_i32, %c0_i32_0 : i32, i32
  }
  func.func @transform_4(%arg0: i32) -> (i32, i32) {
    %c0_i32 = arith.constant 0 : i32
    %c0_i32_0 = arith.constant 0 : i32
    %c0_i32_1 = arith.constant 0 : i32
    return %c0_i32, %c0_i32_0 : i32, i32
  }
  func.func @transform_5(%arg0: i32) -> (i32, i32) {
    %c0_i32 = arith.constant 0 : i32
    %c0_i32_0 = arith.constant 0 : i32
    %c0_i32_1 = arith.constant 0 : i32
    return %c0_i32, %c0_i32_0 : i32, i32
  }
  func.func @transform_6(%arg0: i32) -> (i32, i32) {
    %c0_i32 = arith.constant 0 : i32
    %c0_i32_0 = arith.constant 0 : i32
    %c0_i32_1 = arith.constant 0 : i32
    return %c0_i32, %c0_i32_0 : i32, i32
  }
  func.func @transform_7(%arg0: i32) -> (i32, i32, i32, i32) {
    %c0_i32 = arith.constant 0 : i32
    %c0_i32_0 = arith.constant 0 : i32
    %c0_i32_1 = arith.constant 0 : i32
    %c0_i32_2 = arith.constant 0 : i32
    return %arg0, %c0_i32, %c0_i32_0, %c0_i32_1 : i32, i32, i32, i32
  }
}

</mosaic_0001>

<bundles_post_ra>
// kernel: linear_bottleneck_forward.1
= control target key start
LH: loop header
LB: loop body
LE: loop exit
PB: predicated region body
PF: predicated region fallthrough
CT: control target
= control target key end

     0   :  { %vm116_vm0 = vcmask 1043456   ;;  %vm91_vm1 = vcmask 64512   ;;  %v1559_v10 = vmov 0   ;;  %v369_v21 = vlaneseq  ;;  %s2132_s1 = inlined_call_operand.vmem [shape: bf16[8,128], index: 1, kind: input, shape index: {}]   ;;  %s2133_s0 = inlined_call_operand.vmem [shape: bf16[2,8,8,8], index: 0, kind: input, shape index: {}]   ;;  %s2134_s5 = inlined_call_operand.vmem [shape: bf16[128,8], index: 5, kind: input, shape index: {}]   ;;  %s2135_s2 = inlined_call_operand.vmem [shape: f32[1,128], index: 2, kind: input, shape index: {}]   ;;  %s2136_s3 = inlined_call_operand.vmem [shape: f32[9,128], index: 3, kind: input, shape index: {}]   ;;  %s2137_s4 = inlined_call_operand.vmem [shape: f32[1,128], index: 4, kind: input, shape index: {}]   ;;  %s2138_s6 = inlined_call_operand.vmem [shape: f32[1,8], index: 6, kind: input, shape index: {}]   ;;  %s2139_s7 = inlined_call_operand.vmem [shape: bf16[2,8,8,8], index: 7, kind: output, shape index: {}]  }
   0x1   :  { %v43_v0 = vld [vmem:[%s2132_s1] sm:$0xf]  ;;  %v29_v2 = vld [vmem:[%s2133_s0 + $0x8] sm:$0xff]   ;;  %v31_v4 = vld [vmem:[%s2133_s0 + $0x10] sm:$0xff]   ;;  %249 = vst [vmem:[#allocation2] sm:$0xf] %v1559_v10 }
   0x2   :  { %v27_v1 = vld [vmem:[%s2133_s0] sm:$0xff]   ;;  %1525 = vmatprep.subr.msk.bf16.mxu0 %vm116_vm0, %v43_v0  ;;  %v118_v3 = vsel %vm116_vm0, %v43_v0, 0  ;;  %v33_v5 = vld [vmem:[%s2133_s0 + $0x18] sm:$0xff]   ;;  %v37_v7 = vld [vmem:[%s2133_s0 + $0x28] sm:$0xff]   ;;  %250 = vst [vmem:[#allocation2 + $0x28] sm:$0xf] %v1559_v10 }
   0x3   :  { %1460 = vmatpush3.bf16.msra.mxu0 %v118_v3  ;;  %1461 = vmatprep.mubr.msk.bf16.mxu0 %vm91_vm1, %v27_v1  ;;  %v35_v6 = vld [vmem:[%s2133_s0 + $0x20] sm:$0xff]   ;;  %v39_v8 = vld [vmem:[%s2133_s0 + $0x30] sm:$0xff]   ;;  %v41_v9 = vld [vmem:[%s2133_s0 + $0x38] sm:$0xff]   ;;  %252 = vst [vmem:[#allocation2 + $0x24] sm:$0xf] %v1559_v10  ;;  %v1666_v26 = vshrl.u32 %v369_v21, 7 }
   0x4   :  { %253 = vst [vmem:[#allocation2 + $0x4c] sm:$0xf] %v1559_v10  ;;  %v1535_v11 = vld [vmem:[%s2134_s5 + $0x38] sm:$0xff]   ;;  %v1536_v12 = vld [vmem:[%s2134_s5 + $0x30] sm:$0xff]   ;;  %v1537_v13 = vld [vmem:[%s2134_s5 + $0x28] sm:$0xff]   ;;  %vm1193_vm4 = vcmask 60416  }
   0x5   :  { %1477 = vmatprep.subr.bf16.mxu0 %v1535_v11  ;;  %1509 = vmatprep.subr.bf16.mxu1 %v1535_v11  ;;  %v1538_v14 = vld [vmem:[%s2134_s5 + $0x20] sm:$0xff]   ;;  %v1539_v15 = vld [vmem:[%s2134_s5 + $0x18] sm:$0xff]   ;;  %v1540_v16 = vld [vmem:[%s2134_s5 + $0x10] sm:$0xff]   ;;  %v371_v34 = vsub.s32 0, %v1666_v26  ;;  %v407_v35 = vsub.s32 1, %v1666_v26  ;;  %v511_v42 = vsub.s32 3, %v1666_v26 }
   0x6   :  { %1462 = vmatmul.mubr.msk.bf16.vlgmr.msra.gmra.mxu0 %vm91_vm1, %v29_v2  ;;  %1517 = vmatpush3.bf16.msra.mxu1 %v1535_v11  ;;  %v1541_v17 = vld [vmem:[%s2134_s5 + $0x8] sm:$0xff]   ;;  %v1542_v18 = vld [vmem:[%s2134_s5] sm:$0xff]   ;;  %v547_v43 = vsub.s32 4, %v1666_v26  ;;  %v443_v47 = vsub.s32 2, %v1666_v26  ;;  %v583_v51 = vsub.s32 5, %v1666_v26  ;;  %v652_v52 = vsub.s32 6, %v1666_v26 }
   0x7   :  { %1465 = vmatprep.mubr.msk.bf16.mxu0 %vm91_vm1, %v31_v4  ;;  %1478 = vmatpush3.bf16.msra.mxu0 %v1535_v11  ;;  %v1662_v20 = vld [vmem:[%s2135_s2] ss:$0 sm:$0xff]  ;;  %v688_v56 = vsub.s32 7, %v1666_v26  ;;  %vm776_vm2 = vcmp.eq.s32.totalorder %v1666_v26, 0  ;;  %vm809_vm3 = vcmp.eq.s32.totalorder %v1666_v26, 7  ;;  %v1551_v26 = vld [vmem:[%s2133_s0 + $0x8] sm:$0xff]  }
   0x8   :  { %1479 = vmatprep.subr.bf16.mxu0 %v1536_v12  ;;  %1510 = vmatprep.subr.bf16.mxu1 %v1536_v12  ;;  %v335_v38 = vld [vmem:[%s2136_s3] sm:$0xff] }
   0x9   :  { %v1680_v49 = vrot.slane %v335_v38, %v371_v34  ;;  %v1682_v50 = vrot.slane %v335_v38, %v407_v35  ;;  %v1688_v60 = vrot.slane %v335_v38, %v511_v42  ;;  %v1690_v61 = vrot.slane %v335_v38, %v547_v43  ;;  %v1736_v42 = vld [vmem:[%s2136_s3 + $0x8] ss:$0 sm:$0xff] }
   0xa   :  { %1518 = vmatpush3.bf16.msra.mxu1 %v1536_v12  ;;  %v1695_v3 = vrot.slane %v335_v38, %v443_v47 }
   0xb   :  { %1480 = vmatpush3.bf16.msra.mxu0 %v1536_v12  ;;  %1511 = vmatprep.subr.bf16.mxu1 %v1537_v13 }
   0xc   :  { %1481 = vmatprep.subr.bf16.mxu0 %v1537_v13 }
   0xe   :  { %1466 = vmatmul.mubr.msk.bf16.gmra.mxu0 %vm91_vm1, %v33_v5  ;;  %1519 = vmatpush3.bf16.msra.mxu1 %v1537_v13  ;;  %v1699_v5 = vrot.slane %v335_v38, %v583_v51 }
   0xf   :  { %1469 = vmatprep.mubr.msk.bf16.mxu0 %vm91_vm1, %v35_v6  ;;  %1482 = vmatpush3.bf16.msra.mxu0 %v1537_v13  ;;  %v1701_v6 = vrot.slane %v335_v38, %v652_v52 }
  0x10   :  { %1483 = vmatprep.subr.bf16.mxu0 %v1538_v14  ;;  %1512 = vmatprep.subr.bf16.mxu1 %v1538_v14 }
  0x12   :  { %1520 = vmatpush3.bf16.msra.mxu1 %v1538_v14 }
  0x13   :  { %1484 = vmatpush3.bf16.msra.mxu0 %v1538_v14  ;;  %1513 = vmatprep.subr.bf16.mxu1 %v1539_v15 }
  0x14   :  { %1485 = vmatprep.subr.bf16.mxu0 %v1539_v15 }
  0x16   :  { %1470 = vmatmul.mubr.msk.bf16.gmra.mxu0 %vm91_vm1, %v37_v7  ;;  %1521 = vmatpush3.bf16.msra.mxu1 %v1539_v15 }
  0x17   :  { %1473 = vmatprep.mubr.msk.bf16.mxu0 %vm91_vm1, %v39_v8  ;;  %1486 = vmatpush3.bf16.msra.mxu0 %v1539_v15 }
  0x18   :  { %1487 = vmatprep.subr.bf16.mxu0 %v1540_v16  ;;  %1514 = vmatprep.subr.bf16.mxu1 %v1540_v16 }
  0x1a   :  { %1522 = vmatpush3.bf16.msra.mxu1 %v1540_v16 }
  0x1b   :  { %1488 = vmatpush3.bf16.msra.mxu0 %v1540_v16  ;;  %1515 = vmatprep.subr.bf16.mxu1 %v1541_v17  ;;  %v1710_v16 = vrot.slane %v335_v38, %v688_v56 }
  0x1c   :  { %1489 = vmatprep.subr.bf16.mxu0 %v1541_v17 }
  0x1e   :  { %1474 = vmatmul.mubr.msk.bf16.gmra.mxu0 %vm91_vm1, %v41_v9  ;;  %1523 = vmatpush3.bf16.msra.mxu1 %v1541_v17 }
  0x1f   :  { %1490 = vmatpush3.bf16.msra.mxu0 %v1541_v17  ;;  %1516 = vmatprep.subr.bf16.mxu1 %v1542_v18 }
  0x20   :  { %1491 = vmatprep.subr.bf16.mxu0 %v1542_v18 }
  0x22   :  { %1524 = vmatpush3.bf16.msra.mxu1 %v1542_v18 }
  0x23   :  { %1492 = vmatpush3.bf16.msra.mxu0 %v1542_v18 }
  0xc6   :  { %v1463_v19 = vpop.f32.mrf.mxu0 }
  0xc7   :  { %v163_v23 = vadd.f32 %v1463_v19, %v1662_v20 }
  0xc8   :  { %v154_v22 = vpop.f32.mrf.mxu0 }
  0xc9   :  { %v155_v24 = vadd.f32 %v1662_v20, %v154_v22  ;;  %v219_v30 = vmax.f32 %v163_v23, 0.0 }
  0xca   :  { %v1464_v25 = vpop.f32.mrf.mxu0 }
  0xcb   :  { %v217_v27 = vmax.f32 %v155_v24, 0.0  ;;  %v166_v28 = vadd.f32 %v1464_v25, %v1662_v20  ;;  %v235_v44 = vmin.f32 %v219_v30, 6.0 }
  0xcc   :  { %v157_v29 = vpop.f32.mrf.mxu0 }
  0xcd   :  { %v233_v31 = vmin.f32 %v217_v27, 6.0  ;;  %v158_v32 = vadd.f32 %v1662_v20, %v157_v29  ;;  %v220_v39 = vmax.f32 %v166_v28, 0.0 }
  0xce   :  { %v1467_v33 = vpop.f32.mrf.mxu0 }
  0xcf   :  { %v1266_v36 = vpack.c.bf16 %v233_v31, %v233_v31  ;;  %v218_v37 = vmax.f32 %v158_v32, 0.0  ;;  %v179_v40 = vadd.f32 %v1467_v33, %v1662_v20  ;;  %v236_v57 = vmin.f32 %v220_v39, 6.0 }
  0xd0   :  { %v170_v41 = vpop.f32.mrf.mxu0 }
  0xd1   :  { %319 = vst [vmem:[#allocation2 + $0x4] sm:$0xf] %v1266_v36  ;;  %v234_v45 = vmin.f32 %v218_v37, 6.0  ;;  %v171_v46 = vadd.f32 %v1662_v20, %v170_v41  ;;  %v223_v58 = vmax.f32 %v179_v40, 0.0 }
  0xd2   :  { %v1468_v48 = vpop.f32.mrf.mxu0 }
  0xd3   :  { %v1293_v53 = vpack.c.bf16 %v235_v44, %v234_v45  ;;  %v221_v54 = vmax.f32 %v171_v46, 0.0  ;;  %v182_v55 = vadd.f32 %v1468_v48, %v1662_v20  ;;  %v239_v11 = vmin.f32 %v223_v58, 6.0 }
  0xd4   :  { %v173_v59 = vpop.f32.mrf.mxu0 }
  0xd5   :  { %v237_v62 = vmin.f32 %v221_v54, 6.0  ;;  %v224_v63 = vmax.f32 %v182_v55, 0.0  ;;  %v174_v0 = vadd.f32 %v1662_v20, %v173_v59  ;;  %v1693_v1 = vunpack.c.l.bf16 %v1293_v53 }
  0xd6   :  { %v1471_v2 = vpop.f32.mrf.mxu0  ;;  %v1697_v4 = vunpack.c.h.bf16 %v1293_v53 }
  0xd7   :  { %v1703_v7 = vpack.c.bf16 %v237_v62, %v236_v57  ;;  %v240_v8 = vmin.f32 %v224_v63, 6.0  ;;  %v222_v9 = vmax.f32 %v174_v0, 0.0  ;;  %v195_v10 = vadd.f32 %v1471_v2, %v1662_v20 }
  0xd8   :  { %v186_v12 = vpop.f32.mrf.mxu0  ;;  %v1321_v13 = vld [vmem:[#allocation2] sm:$0xff]   ;;  %v514_v14 = vmul.f32 %v1693_v1, %v1688_v60  ;;  %v550_v15 = vmul.f32 %v1693_v1, %v1690_v61  ;;  %v586_v25 = vmul.f32 %v1693_v1, %v1699_v5  ;;  %v1717_v27 = vmul.f32 %v1693_v1, %v1701_v6 }
  0xd9   :  { %v1273_v17 = vpack.c.bf16 %v240_v8, %v240_v8  ;;  %v238_v18 = vmin.f32 %v222_v9, 6.0  ;;  %v227_v19 = vmax.f32 %v195_v10, 0.0  ;;  %v187_v21 = vadd.f32 %v1662_v20, %v186_v12 }
  0xda   :  { %v1472_v22 = vpop.f32.mrf.mxu0  ;;  %v1322_v23 = vunpack.c.l.bf16 %v1321_v13  ;;  %v1323_v24 = vunpack.c.h.bf16 %v1321_v13  ;;  %v655_v31 = vmul.f32 %v1697_v4, %v1701_v6  ;;  %v1729_v36 = vmul.f32 %v1693_v1, %v1710_v16 }
  0xdb   :  { %326 = vst [vmem:[#allocation2 + $0x20] sm:$0xf] %v1273_v17  ;;  %v1719_v28 = vpack.c.bf16 %v239_v11, %v238_v18  ;;  %v225_v29 = vmax.f32 %v187_v21, 0.0  ;;  %v198_v30 = vadd.f32 %v1472_v22, %v1662_v20  ;;  %v243_v32 = vmin.f32 %v227_v19, 6.0 }
  0xdc   :  { %v189_v33 = vpop.f32.mrf.mxu0  ;;  %v374_v34 = vmul.f32 %v1323_v24, %v1680_v49  ;;  %v410_v35 = vmul.f32 %v1323_v24, %v1682_v50  ;;  %v373_v40 = vmul.f32 %v1322_v23, %v1680_v49  ;;  %v409_v43 = vmul.f32 %v1322_v23, %v1682_v50 }
  0xdd   :  { %v241_v37 = vmin.f32 %v225_v29, 6.0  ;;  %v228_v38 = vmax.f32 %v198_v30, 0.0  ;;  %v190_v39 = vadd.f32 %v1662_v20, %v189_v33  ;;  %v446_v44 = vmul.f32 %v1323_v24, %v1695_v3 }
  0xde   :  { %v1475_v41 = vpop.f32.mrf.mxu0  ;;  %v530_v45 = vadd.f32 %v514_v14, %v374_v34  ;;  %v566_v46 = vadd.f32 %v550_v15, %v410_v35  ;;  %v691_v52 = vmul.f32 %v1697_v4, %v1710_v16  ;;  %v445_v55 = vmul.f32 %v1322_v23, %v1695_v3 }
  0xdf   :  { %v1274_v47 = vpack.c.bf16 %v241_v37, %v241_v37  ;;  %v226_v48 = vmax.f32 %v190_v39, 0.0  ;;  %v211_v51 = vadd.f32 %v1475_v41, %v1662_v20  ;;  %v244_v53 = vmin.f32 %v228_v38, 6.0 }
  0xe0   :  { %v202_v54 = vpop.f32.mrf.mxu0  ;;  %v602_v56 = vadd.f32 %v586_v25, %v446_v44  ;;  %v671_v57 = vadd.f32 %v655_v31, %v530_v45  ;;  %v707_v62 = vadd.f32 %v691_v52, %v566_v46  ;;  %v726_v63 = vmul.f32 %v1693_v1, %v1736_v42 }
  0xe1   :  { %327 = vst [vmem:[#allocation2 + $0x2c] sm:$0xf] %v1274_v47  ;;  %v242_v58 = vmin.f32 %v226_v48, 6.0  ;;  %v203_v59 = vadd.f32 %v1662_v20, %v202_v54  ;;  %v231_v0 = vmax.f32 %v211_v51, 0.0  ;;  %v727_v9 = vmul.f32 %v1697_v4, %v1736_v42 }
  0xe2   :  { %v1476_v2 = vpop.f32.mrf.mxu0  ;;  %v1748_v8 = vld [vmem:[#allocation2 + $0x4] ss:$28 sps:$4 sm:$0xff]   ;;  %v761_v10 = vrot.slane %v671_v57, 7  ;;  %v375_v11 = vmul.f32 %v1693_v1, %v1680_v49  ;;  %v376_v15 = vmul.f32 %v1697_v4, %v1680_v49  ;;  %v411_v22 = vmul.f32 %v1693_v1, %v1682_v50 }
  0xe3   :  { %v1754_v12 = vpack.c.bf16 %v243_v32, %v242_v58  ;;  %v229_v13 = vmax.f32 %v203_v59, 0.0  ;;  %v214_v14 = vadd.f32 %v1476_v2, %v1662_v20  ;;  %v493_v18 = vunpack.c.l.bf16 %v1748_v8 }
  0xe4   :  { %v205_v17 = vpop.f32.mrf.mxu0  ;;  %v743_v19 = vadd.f32 %v727_v9, %v602_v56  ;;  %v778_v21 = vsel %vm776_vm2, 0.0, %v761_v10  ;;  %v247_v34 = vmin.f32 %v231_v0, 6.0  ;;  %v1358_v54 = vunpack.c.l.bf16 %v1703_v7 }
  0xe5   :  { %v245_v23 = vmin.f32 %v229_v13, 6.0  ;;  %v232_v24 = vmax.f32 %v214_v14, 0.0  ;;  %v206_v25 = vadd.f32 %v1662_v20, %v205_v17  ;;  %v827_v29 = vadd.f32 %v778_v21, %v707_v62 }
  0xe6   :  { %v513_v30 = vmul.f32 %v1688_v60, %v493_v18  ;;  %v549_v31 = vmul.f32 %v1690_v61, %v493_v18  ;;  %v585_v32 = vmul.f32 %v1699_v5, %v493_v18  ;;  %v794_v33 = vrot.slane %v743_v19, 1 }
  0xe7   :  { %v1768_v35 = vpack.c.bf16 %v245_v23, %v244_v53  ;;  %v248_v37 = vmin.f32 %v232_v24, 6.0  ;;  %v230_v38 = vmax.f32 %v206_v25, 0.0  ;;  %v412_v20 = vmul.f32 %v1697_v4, %v1682_v50  ;;  %v1778_v53 = vld [vmem:[%s2137_s4] ss:$0 sm:$0xff] }
  0xe8   :  { %v529_v39 = vadd.f32 %v513_v30, %v373_v40  ;;  %v601_v41 = vadd.f32 %v585_v32, %v445_v55  ;;  %v811_v44 = vsel %vm809_vm3, 0.0, %v794_v33  ;;  %v565_v47 = vadd.f32 %v549_v31, %v409_v43 }
  0xe9   :  { %v1281_v45 = vpack.c.bf16 %v248_v37, %v248_v37  ;;  %v246_v46 = vmin.f32 %v230_v38, 6.0  ;;  %v843_v48 = vadd.f32 %v827_v29, %v811_v44  ;;  %v447_v40 = vmul.f32 %v1693_v1, %v1695_v3 }
  0xea   :  { %v670_v51 = vadd.f32 %v1717_v27, %v529_v39  ;;  %v742_v52 = vadd.f32 %v726_v63, %v601_v41  ;;  %v515_v43 = vmul.f32 %v1697_v4, %v1688_v60  ;;  %v551_v27 = vmul.f32 %v1697_v4, %v1690_v61 }
  0xeb   :  { %334 = vst [vmem:[#allocation2 + $0x48] sm:$0xf] %v1281_v45  ;;  %v1783_v55 = vpack.c.bf16 %v247_v34, %v246_v46  ;;  %v866_v56 = vadd.f32 %v1778_v53, %v843_v48  ;;  %v516_v59 = vmul.f32 %v1358_v54, %v1688_v60  ;;  %v552_v62 = vmul.f32 %v1358_v54, %v1690_v61 }
  0xec   :  { %v760_v57 = vrot.slane %v670_v51, 7  ;;  %v793_v58 = vrot.slane %v742_v52, 1  ;;  %v706_v1 = vadd.f32 %v1729_v36, %v565_v47  ;;  %v448_v0 = vmul.f32 %v1697_v4, %v1695_v3 }
  0xed   :  { %v882_v63 = vmax.f32 %v866_v56, 0.0  ;;  %v587_v2 = vmul.f32 %v1697_v4, %v1699_v5  ;;  %v531_v13 = vadd.f32 %v515_v43, %v375_v11  ;;  %v567_v14 = vadd.f32 %v551_v27, %v411_v22 }
  0xee   :  { %v777_v9 = vsel %vm776_vm2, 0.0, %v760_v57  ;;  %v810_v10 = vsel %vm809_vm3, 0.0, %v793_v58  ;;  %v532_v18 = vadd.f32 %v516_v59, %v376_v15  ;;  %v568_v19 = vadd.f32 %v552_v62, %v412_v20 }
  0xef   :  { %v826_v17 = vadd.f32 %v777_v9, %v706_v1  ;;  %v588_v36 = vmul.f32 %v1358_v54, %v1699_v5  ;;  %v1383_v21 = vunpack.c.h.bf16 %v1703_v7  ;;  %v656_v23 = vmul.f32 %v1358_v54, %v1701_v6 }
  0xf0   :  { %v692_v24 = vmul.f32 %v1358_v54, %v1710_v16  ;;  %v728_v4 = vmul.f32 %v1358_v54, %v1736_v42  ;;  %v898_v29 = vmin.f32 %v882_v63, 6.0  ;;  %v603_v30 = vadd.f32 %v587_v2, %v447_v40 }
  0xf1   :  { %v842_v25 = vadd.f32 %v826_v17, %v810_v10  ;;  %v604_v31 = vadd.f32 %v588_v36, %v448_v0  ;;  %v657_v11 = vmul.f32 %v1383_v21, %v1701_v6  ;;  %v672_v22 = vadd.f32 %v656_v23, %v531_v13 }
  0xf2   :  { %v377_v15 = vmul.f32 %v1358_v54, %v1680_v49  ;;  %v413_v32 = vmul.f32 %v1358_v54, %v1682_v50  ;;  %v693_v7 = vmul.f32 %v1383_v21, %v1710_v16  ;;  %v729_v34 = vmul.f32 %v1383_v21, %v1736_v42 }
  0xf3   :  { %v865_v33 = vadd.f32 %v1778_v53, %v842_v25  ;;  %v744_v37 = vadd.f32 %v728_v4, %v603_v30  ;;  %v673_v38 = vadd.f32 %v657_v11, %v532_v18  ;;  %v708_v39 = vadd.f32 %v692_v24, %v567_v14 }
  0xf4   :  { %v762_v41 = vrot.slane %v672_v22, 7  ;;  %v378_v44 = vmul.f32 %v1383_v21, %v1680_v49  ;;  %v709_v45 = vadd.f32 %v693_v7, %v568_v19  ;;  %v745_v46 = vadd.f32 %v729_v34, %v604_v31 }
  0xf5   :  { %v881_v20 = vmax.f32 %v865_v33, 0.0  ;;  %v795_v47 = vrot.slane %v744_v37, 1  ;;  %v763_v48 = vrot.slane %v673_v38, 7  ;;  %v449_v52 = vmul.f32 %v1358_v54, %v1695_v3 }
  0xf6   :  { %v779_v51 = vsel %vm776_vm2, 0.0, %v762_v41  ;;  %v1362_v40 = vunpack.c.l.bf16 %v1719_v28  ;;  %v796_v43 = vrot.slane %v745_v46, 1  ;;  %v1822_v59 = vunpack.c.h.bf16 %v1719_v28 }
  0xf7   :  { %v897_v56 = vmin.f32 %v881_v20, 6.0  ;;  %v812_v27 = vsel %vm809_vm3, 0.0, %v795_v47  ;;  %v828_v57 = vadd.f32 %v779_v51, %v708_v39  ;;  %v780_v58 = vsel %vm776_vm2, 0.0, %v763_v48 }
  0xf8   :  { %v517_v62 = vmul.f32 %v1383_v21, %v1688_v60  ;;  %v518_v1 = vmul.f32 %v1362_v40, %v1688_v60  ;;  %v829_v54 = vadd.f32 %v780_v58, %v709_v45  ;;  %v450_v2 = vmul.f32 %v1383_v21, %v1695_v3 }
  0xf9   :  { %v1282_v63 = vpack.c.bf16 %v898_v29, %v897_v56  ;;  %v844_v0 = vadd.f32 %v828_v57, %v812_v27  ;;  %v813_v9 = vsel %vm809_vm3, 0.0, %v796_v43  ;;  %v553_v13 = vmul.f32 %v1383_v21, %v1690_v61 }
  0xfa   :  { %v534_v10 = vadd.f32 %v518_v1, %v378_v44  ;;  %v554_v14 = vmul.f32 %v1362_v40, %v1690_v61  ;;  %v845_v28 = vadd.f32 %v829_v54, %v813_v9  ;;  %v589_v18 = vmul.f32 %v1383_v21, %v1699_v5 }
  0xfb   :  { %1493 = vmatprep.mubr.bf16.mxu0 %v1282_v63  ;;  %v867_v17 = vadd.f32 %v1778_v53, %v844_v0  ;;  %v590_v19 = vmul.f32 %v1362_v40, %v1699_v5  ;;  %v414_v36 = vmul.f32 %v1383_v21, %v1682_v50  ;;  %v533_v23 = vadd.f32 %v517_v62, %v377_v15 }
  0xfc   :  { %v658_v24 = vmul.f32 %v1362_v40, %v1701_v6  ;;  %v659_v4 = vmul.f32 %v1822_v59, %v1701_v6  ;;  %v868_v25 = vadd.f32 %v1778_v53, %v845_v28  ;;  %v569_v30 = vadd.f32 %v553_v13, %v413_v32  ;;  %v1429_v28 = vld [vmem:[#allocation2 + $0x20] sm:$0xff]  }
  0xfd   :  { %v883_v29 = vmax.f32 %v867_v17, 0.0  ;;  %v606_v31 = vadd.f32 %v590_v19, %v450_v2  ;;  %v570_v11 = vadd.f32 %v554_v14, %v414_v36  ;;  %v694_v7 = vmul.f32 %v1362_v40, %v1710_v16 }
  0xfe   :  { %v674_v22 = vadd.f32 %v658_v24, %v533_v23  ;;  %v675_v33 = vadd.f32 %v659_v4, %v534_v10  ;;  %v884_v34 = vmax.f32 %v868_v25, 0.0  ;;  %v605_v37 = vadd.f32 %v589_v18, %v449_v52  ;;  %v1417_v25 = vld [vmem:[#allocation2 + $0x28] sm:$0xff]  }
  0xff   :  { %v730_v21 = vmul.f32 %v1362_v40, %v1736_v42  ;;  %v731_v15 = vmul.f32 %v1822_v59, %v1736_v42  ;;  %v899_v38 = vmin.f32 %v883_v29, 6.0  ;;  %v695_v39 = vmul.f32 %v1822_v59, %v1710_v16 }
 0x100   :  { %v764_v41 = vrot.slane %v674_v22, 7  ;;  %v765_v44 = vrot.slane %v675_v33, 7  ;;  %v900_v32 = vmin.f32 %v884_v34, 6.0  ;;  %v710_v20 = vadd.f32 %v694_v7, %v569_v30 }
 0x101   :  { %v746_v45 = vadd.f32 %v730_v21, %v605_v37  ;;  %v747_v46 = vadd.f32 %v731_v15, %v606_v31  ;;  %v711_v47 = vadd.f32 %v695_v39, %v570_v11  ;;  %v379_v52 = vmul.f32 %v1362_v40, %v1680_v49 }
 0x102   :  { %v781_v48 = vsel %vm776_vm2, 0.0, %v764_v41  ;;  %v782_v51 = vsel %vm776_vm2, 0.0, %v765_v44  ;;  %v1283_v56 = vpack.c.bf16 %v900_v32, %v899_v38  ;;  %v380_v62 = vmul.f32 %v1822_v59, %v1680_v49 }
 0x103   :  { %v797_v43 = vrot.slane %v746_v45, 1  ;;  %v798_v27 = vrot.slane %v747_v46, 1  ;;  %v830_v57 = vadd.f32 %v781_v48, %v710_v20  ;;  %v831_v58 = vadd.f32 %v782_v51, %v711_v47 }
 0x104   :  { %v415_v1 = vmul.f32 %v1362_v40, %v1682_v50  ;;  %v451_v63 = vmul.f32 %v1362_v40, %v1695_v3  ;;  %1494 = vmatmul.mubr.bf16.vlgmr.msra.gmra.mxu0 %v1283_v56  ;;  %v500_v2 = vunpack.c.h.bf16 %v1748_v8  ;;  %v519_v9 = vmul.f32 %v1822_v59, %v1688_v60 }
 0x105   :  { %v814_v54 = vsel %vm809_vm3, 0.0, %v797_v43  ;;  %v815_v0 = vsel %vm809_vm3, 0.0, %v798_v27  ;;  %v416_v14 = vmul.f32 %v1822_v59, %v1682_v50  ;;  %v591_v40 = vmul.f32 %v1822_v59, %v1699_v5 }
 0x106   :  { %v846_v10 = vadd.f32 %v830_v57, %v814_v54  ;;  %v847_v13 = vadd.f32 %v831_v58, %v815_v0  ;;  %v452_v17 = vmul.f32 %v1822_v59, %v1695_v3  ;;  %v520_v18 = vmul.f32 %v1688_v60, %v500_v2  ;;  %v1880_v57 = vld [vmem:[#allocation2 + $0x2c] ss:$28 sps:$4 sm:$0xff]  }
 0x107   :  { %v556_v19 = vmul.f32 %v1690_v61, %v500_v2  ;;  %v592_v8 = vmul.f32 %v1699_v5, %v500_v2  ;;  %v535_v24 = vadd.f32 %v519_v9, %v379_v52  ;;  %v555_v4 = vmul.f32 %v1822_v59, %v1690_v61 }
 0x108   :  { %v869_v36 = vadd.f32 %v1778_v53, %v846_v10  ;;  %v870_v23 = vadd.f32 %v1778_v53, %v847_v13  ;;  %v536_v29 = vadd.f32 %v520_v18, %v380_v62  ;;  %v607_v31 = vadd.f32 %v591_v40, %v451_v63 }
 0x109   :  { %v572_v30 = vadd.f32 %v556_v19, %v416_v14  ;;  %v1390_v11 = vunpack.c.l.bf16 %v1429_v28  ;;  %v608_v7 = vadd.f32 %v592_v8, %v452_v17  ;;  %v1391_v34 = vunpack.c.h.bf16 %v1429_v28 }
 0x10a   :  { %v885_v22 = vmax.f32 %v869_v36, 0.0  ;;  %v886_v33 = vmax.f32 %v870_v23, 0.0  ;;  %v1338_v38 = vunpack.c.l.bf16 %v1417_v25  ;;  %v1339_v44 = vunpack.c.h.bf16 %v1417_v25 }
 0x10b   :  { %v660_v37 = vmul.f32 %v1390_v11, %v1701_v6  ;;  %v696_v21 = vmul.f32 %v1390_v11, %v1710_v16  ;;  %v732_v15 = vmul.f32 %v1390_v11, %v1736_v42  ;;  %v661_v59 = vmul.f32 %v1391_v34, %v1701_v6 }
 0x10c   :  { %v901_v39 = vmin.f32 %v885_v22, 6.0  ;;  %v902_v41 = vmin.f32 %v886_v33, 6.0  ;;  %v571_v32 = vadd.f32 %v555_v4, %v415_v1  ;;  %v733_v45 = vmul.f32 %v1391_v34, %v1736_v42 }
 0x10d   :  { %v676_v20 = vadd.f32 %v660_v37, %v535_v24  ;;  %v748_v46 = vadd.f32 %v732_v15, %v607_v31  ;;  %v677_v48 = vadd.f32 %v661_v59, %v536_v29  ;;  %v697_v51 = vmul.f32 %v1391_v34, %v1710_v16 }
 0x10e   :  { %v1284_v47 = vpack.c.bf16 %v902_v41, %v901_v39  ;;  %v712_v52 = vadd.f32 %v696_v21, %v571_v32  ;;  %v749_v56 = vadd.f32 %v733_v45, %v608_v7  ;;  %v381_v63 = vmul.f32 %v1338_v38, %v1680_v49 }
 0x10f   :  { %v766_v43 = vrot.slane %v676_v20, 7  ;;  %v799_v27 = vrot.slane %v748_v46, 1  ;;  %v713_v58 = vadd.f32 %v697_v51, %v572_v30  ;;  %v767_v62 = vrot.slane %v677_v48, 7 }
 0x110   :  { %1497 = vmatprep.mubr.bf16.mxu1 %v1284_v47  ;;  %v382_v1 = vmul.f32 %v1339_v44, %v1680_v49  ;;  %v800_v0 = vrot.slane %v749_v56, 1  ;;  %v418_v9 = vmul.f32 %v1339_v44, %v1682_v50  ;;  %v1366_v14 = vunpack.c.l.bf16 %v1754_v12 }
 0x111   :  { %v783_v54 = vsel %vm776_vm2, 0.0, %v766_v43  ;;  %v816_v2 = vsel %vm809_vm3, 0.0, %v799_v27  ;;  %v784_v10 = vsel %vm776_vm2, 0.0, %v767_v62  ;;  %v501_v40 = vunpack.c.l.bf16 %v1880_v57 }
 0x112   :  { %v832_v13 = vadd.f32 %v783_v54, %v712_v52  ;;  %v817_v28 = vsel %vm809_vm3, 0.0, %v800_v0  ;;  %v833_v17 = vadd.f32 %v784_v10, %v713_v58  ;;  %v454_v18 = vmul.f32 %v1339_v44, %v1695_v3 }
 0x113   :  { %v1395_v19 = vunpack.c.h.bf16 %v1754_v12  ;;  %v521_v36 = vmul.f32 %v1688_v60, %v501_v40  ;;  %v522_v23 = vmul.f32 %v1366_v14, %v1688_v60  ;;  %v557_v24 = vmul.f32 %v1690_v61, %v501_v40 }
 0x114   :  { %v848_v8 = vadd.f32 %v832_v13, %v816_v2  ;;  %v849_v4 = vadd.f32 %v833_v17, %v817_v28  ;;  %v453_v25 = vmul.f32 %v1338_v38, %v1695_v3  ;;  %v593_v29 = vmul.f32 %v1699_v5, %v501_v40 }
 0x115   :  { %v594_v30 = vmul.f32 %v1366_v14, %v1699_v5  ;;  %v417_v11 = vmul.f32 %v1338_v38, %v1682_v50  ;;  %v537_v22 = vadd.f32 %v521_v36, %v381_v63  ;;  %v538_v12 = vadd.f32 %v522_v23, %v382_v1 }
 0x116   :  { %v871_v31 = vadd.f32 %v1778_v53, %v848_v8  ;;  %v872_v33 = vadd.f32 %v1778_v53, %v849_v4  ;;  %v558_v7 = vmul.f32 %v1366_v14, %v1690_v61  ;;  %v609_v34 = vadd.f32 %v593_v29, %v453_v25 }
 0x117   :  { %v610_v37 = vadd.f32 %v594_v30, %v454_v18  ;;  %v573_v15 = vadd.f32 %v557_v24, %v417_v11  ;;  %v662_v39 = vmul.f32 %v1366_v14, %v1701_v6  ;;  %v663_v41 = vmul.f32 %v1395_v19, %v1701_v6 }
 0x118   :  { %v887_v21 = vmax.f32 %v871_v31, 0.0  ;;  %v888_v59 = vmax.f32 %v872_v33, 0.0  ;;  %v574_v44 = vadd.f32 %v558_v7, %v418_v9  ;;  %v734_v32 = vmul.f32 %v1366_v14, %v1736_v42 }
 0x119   :  { %v735_v38 = vmul.f32 %v1395_v19, %v1736_v42  ;;  %v678_v20 = vadd.f32 %v662_v39, %v537_v22  ;;  %v679_v45 = vadd.f32 %v663_v41, %v538_v12  ;;  %v698_v46 = vmul.f32 %v1366_v14, %v1710_v16 }
 0x11a   :  { %v699_v47 = vmul.f32 %v1395_v19, %v1710_v16  ;;  %v903_v48 = vmin.f32 %v887_v21, 6.0  ;;  %v904_v51 = vmin.f32 %v888_v59, 6.0  ;;  %v750_v52 = vadd.f32 %v734_v32, %v609_v34 }
 0x11b   :  { %v751_v56 = vadd.f32 %v735_v38, %v610_v37  ;;  %v714_v43 = vadd.f32 %v698_v46, %v573_v15  ;;  %v768_v27 = vrot.slane %v678_v20, 7  ;;  %v769_v58 = vrot.slane %v679_v45, 7 }
 0x11c   :  { %v1914_v62 = vunpack.c.l.bf16 %v1768_v35  ;;  %v1285_v63 = vpack.c.bf16 %v904_v51, %v903_v48  ;;  %v715_v1 = vadd.f32 %v699_v47, %v574_v44  ;;  %v801_v54 = vrot.slane %v750_v52, 1 }
 0x11d   :  { %v802_v0 = vrot.slane %v751_v56, 1  ;;  %v785_v2 = vsel %vm776_vm2, 0.0, %v768_v27  ;;  %v786_v9 = vsel %vm776_vm2, 0.0, %v769_v58  ;;  %v383_v10 = vmul.f32 %v1366_v14, %v1680_v49 }
 0x11e   :  { %v384_v13 = vmul.f32 %v1395_v19, %v1680_v49  ;;  %1498 = vmatmul.mubr.bf16.vlgmr.msra.gmra.mxu1 %v1285_v63  ;;  %v834_v40 = vadd.f32 %v785_v2, %v714_v43  ;;  %v835_v28 = vadd.f32 %v786_v9, %v715_v1  ;;  %v419_v17 = vmul.f32 %v1366_v14, %v1682_v50 }
 0x11f   :  { %v455_v18 = vmul.f32 %v1366_v14, %v1695_v3  ;;  %v818_v8 = vsel %vm809_vm3, 0.0, %v801_v54  ;;  %v819_v36 = vsel %vm809_vm3, 0.0, %v802_v0  ;;  %v523_v23 = vmul.f32 %v1395_v19, %v1688_v60 }
 0x120   :  { %v524_v24 = vmul.f32 %v1914_v62, %v1688_v60  ;;  %v850_v4 = vadd.f32 %v834_v40, %v818_v8  ;;  %v851_v25 = vadd.f32 %v835_v28, %v819_v36  ;;  %v420_v29 = vmul.f32 %v1395_v19, %v1682_v50 }
 0x121   :  { %v595_v30 = vmul.f32 %v1395_v19, %v1699_v5  ;;  %v456_v31 = vmul.f32 %v1395_v19, %v1695_v3  ;;  %v559_v14 = vmul.f32 %v1395_v19, %v1690_v61  ;;  %v560_v11 = vmul.f32 %v1914_v62, %v1690_v61 }
 0x122   :  { %v596_v22 = vmul.f32 %v1914_v62, %v1699_v5  ;;  %v873_v12 = vadd.f32 %v1778_v53, %v850_v4  ;;  %v874_v33 = vadd.f32 %v1778_v53, %v851_v25  ;;  %v539_v7 = vadd.f32 %v523_v23, %v383_v10 }
 0x123   :  { %v540_v34 = vadd.f32 %v524_v24, %v384_v13  ;;  %v611_v37 = vadd.f32 %v595_v30, %v455_v18  ;;  %v1399_v15 = vunpack.c.h.bf16 %v1768_v35  ;;  %v664_v39 = vmul.f32 %v1914_v62, %v1701_v6 }
 0x124   :  { %v612_v21 = vadd.f32 %v596_v22, %v456_v31  ;;  %v889_v19 = vmax.f32 %v873_v12, 0.0  ;;  %v890_v41 = vmax.f32 %v874_v33, 0.0  ;;  %v700_v59 = vmul.f32 %v1914_v62, %v1710_v16 }
 0x125   :  { %v736_v44 = vmul.f32 %v1914_v62, %v1736_v42  ;;  %v575_v32 = vadd.f32 %v559_v14, %v419_v17  ;;  %v576_v38 = vadd.f32 %v560_v11, %v420_v29  ;;  %v665_v20 = vmul.f32 %v1399_v15, %v1701_v6 }
 0x126   :  { %v680_v45 = vadd.f32 %v664_v39, %v539_v7  ;;  %v905_v46 = vmin.f32 %v889_v19, 6.0  ;;  %v906_v47 = vmin.f32 %v890_v41, 6.0  ;;  %v737_v35 = vmul.f32 %v1399_v15, %v1736_v42 }
 0x127   :  { %v752_v48 = vadd.f32 %v736_v44, %v611_v37  ;;  %v681_v51 = vadd.f32 %v665_v20, %v540_v34  ;;  %v701_v52 = vmul.f32 %v1399_v15, %v1710_v16  ;;  %v385_v43 = vmul.f32 %v1914_v62, %v1680_v49 }
 0x128   :  { %v770_v56 = vrot.slane %v680_v45, 7  ;;  %v1286_v27 = vpack.c.bf16 %v906_v47, %v905_v46  ;;  %v716_v58 = vadd.f32 %v700_v59, %v575_v32  ;;  %v753_v63 = vadd.f32 %v737_v35, %v612_v21 }
 0x129   :  { %v803_v1 = vrot.slane %v752_v48, 1  ;;  %v717_v54 = vadd.f32 %v701_v52, %v576_v38  ;;  %v771_v0 = vrot.slane %v681_v51, 7  ;;  %v386_v9 = vmul.f32 %v1399_v15, %v1680_v49 }
 0x12a   :  { %v787_v2 = vsel %vm776_vm2, 0.0, %v770_v56  ;;  %1501 = vmatprep.mubr.bf16.mxu1 %v1286_v27  ;;  %v804_v10 = vrot.slane %v753_v63, 1  ;;  %v421_v40 = vmul.f32 %v1914_v62, %v1682_v50  ;;  %v422_v28 = vmul.f32 %v1399_v15, %v1682_v50 }
 0x12b   :  { %v836_v13 = vadd.f32 %v787_v2, %v716_v58  ;;  %v788_v17 = vsel %vm776_vm2, 0.0, %v771_v0  ;;  %v820_v18 = vsel %vm809_vm3, 0.0, %v803_v1  ;;  %v1374_v8 = vunpack.c.l.bf16 %v1783_v55 }
 0x12c   :  { %v525_v36 = vmul.f32 %v1399_v15, %v1688_v60  ;;  %v837_v23 = vadd.f32 %v788_v17, %v717_v54  ;;  %v457_v4 = vmul.f32 %v1914_v62, %v1695_v3  ;;  %v458_v25 = vmul.f32 %v1399_v15, %v1695_v3 }
 0x12d   :  { %v852_v24 = vadd.f32 %v836_v13, %v820_v18  ;;  %v821_v29 = vsel %vm809_vm3, 0.0, %v804_v10  ;;  %v526_v30 = vmul.f32 %v1374_v8, %v1688_v60  ;;  %v561_v31 = vmul.f32 %v1399_v15, %v1690_v61 }
 0x12e   :  { %v597_v14 = vmul.f32 %v1399_v15, %v1699_v5  ;;  %v853_v11 = vadd.f32 %v837_v23, %v821_v29  ;;  %v562_v12 = vmul.f32 %v1374_v8, %v1690_v61  ;;  %v598_v33 = vmul.f32 %v1374_v8, %v1699_v5 }
 0x12f   :  { %v875_v22 = vadd.f32 %v1778_v53, %v852_v24  ;;  %v541_v7 = vadd.f32 %v525_v36, %v385_v43  ;;  %v542_v62 = vadd.f32 %v526_v30, %v386_v9  ;;  %v1403_v34 = vunpack.c.h.bf16 %v1783_v55  ;;  %v1433_v9 = vld [vmem:[#allocation2 + $0x48] sm:$0xff]  }
 0x130   :  { %v666_v37 = vmul.f32 %v1374_v8, %v1701_v6  ;;  %v876_v21 = vadd.f32 %v1778_v53, %v853_v11  ;;  %v614_v19 = vadd.f32 %v598_v33, %v458_v25  ;;  %v702_v41 = vmul.f32 %v1374_v8, %v1710_v16 }
 0x131   :  { %v891_v39 = vmax.f32 %v875_v22, 0.0  ;;  %v613_v15 = vadd.f32 %v597_v14, %v457_v4  ;;  %v667_v59 = vmul.f32 %v1403_v34, %v1701_v6  ;;  %v738_v32 = vmul.f32 %v1374_v8, %v1736_v42 }
 0x132   :  { %v682_v44 = vadd.f32 %v666_v37, %v541_v7  ;;  %v892_v38 = vmax.f32 %v876_v21, 0.0  ;;  %v577_v20 = vadd.f32 %v561_v31, %v421_v40  ;;  %v578_v45 = vadd.f32 %v562_v12, %v422_v28 }
 0x133   :  { %v739_v46 = vmul.f32 %v1403_v34, %v1736_v42  ;;  %v683_v55 = vadd.f32 %v667_v59, %v542_v62  ;;  %v703_v47 = vmul.f32 %v1403_v34, %v1710_v16  ;;  %v754_v35 = vadd.f32 %v738_v32, %v613_v15 }
 0x134   :  { %v772_v48 = vrot.slane %v682_v44, 7  ;;  %v907_v51 = vmin.f32 %v891_v39, 6.0  ;;  %v908_v52 = vmin.f32 %v892_v38, 6.0  ;;  %v718_v56 = vadd.f32 %v702_v41, %v577_v20 }
 0x135   :  { %v755_v43 = vadd.f32 %v739_v46, %v614_v19  ;;  %v773_v27 = vrot.slane %v683_v55, 7  ;;  %v805_v63 = vrot.slane %v754_v35, 1  ;;  %v719_v54 = vadd.f32 %v703_v47, %v578_v45 }
 0x136   :  { %v789_v58 = vsel %vm776_vm2, 0.0, %v772_v48  ;;  %v1287_v1 = vpack.c.bf16 %v908_v52, %v907_v51  ;;  %v387_v40 = vmul.f32 %v1374_v8, %v1680_v49  ;;  %v388_v28 = vmul.f32 %v1403_v34, %v1680_v49 }
 0x137   :  { %v806_v0 = vrot.slane %v755_v43, 1  ;;  %v838_v2 = vadd.f32 %v789_v58, %v718_v56  ;;  %v790_v10 = vsel %vm776_vm2, 0.0, %v773_v27  ;;  %v822_v13 = vsel %vm809_vm3, 0.0, %v805_v63 }
 0x138   :  { %1502 = vmatmul.mubr.bf16.gmra.mxu1 %v1287_v1  ;;  %v839_v17 = vadd.f32 %v790_v10, %v719_v54  ;;  %v459_v36 = vmul.f32 %v1374_v8, %v1695_v3  ;;  %v508_v23 = vunpack.c.h.bf16 %v1880_v57  ;;  %v527_v4 = vmul.f32 %v1403_v34, %v1688_v60 }
 0x139   :  { %v854_v18 = vadd.f32 %v838_v2, %v822_v13  ;;  %v823_v24 = vsel %vm809_vm3, 0.0, %v806_v0  ;;  %v599_v25 = vmul.f32 %v1403_v34, %v1699_v5  ;;  %v1406_v29 = vunpack.c.l.bf16 %v1433_v9 }
 0x13a   :  { %v855_v30 = vadd.f32 %v839_v17, %v823_v24  ;;  %v423_v49 = vmul.f32 %v1374_v8, %v1682_v50  ;;  %v528_v14 = vmul.f32 %v1688_v60, %v508_v23  ;;  %v424_v11 = vmul.f32 %v1403_v34, %v1682_v50 }
 0x13b   :  { %v877_v31 = vadd.f32 %v1778_v53, %v854_v18  ;;  %v563_v22 = vmul.f32 %v1403_v34, %v1690_v61  ;;  %v564_v57 = vmul.f32 %v1690_v61, %v508_v23  ;;  %v600_v12 = vmul.f32 %v1699_v5, %v508_v23 }
 0x13c   :  { %v878_v33 = vadd.f32 %v1778_v53, %v855_v30  ;;  %v460_v62 = vmul.f32 %v1403_v34, %v1695_v3  ;;  %v543_v37 = vadd.f32 %v527_v4, %v387_v40  ;;  %v544_v21 = vadd.f32 %v528_v14, %v388_v28  ;;  %v2026_v28 = vld [vmem:[%s2138_s6] ss:$0 sm:$0xff] }
 0x13d   :  { %v893_v7 = vmax.f32 %v877_v31, 0.0  ;;  %v615_v39 = vadd.f32 %v599_v25, %v459_v36  ;;  %v1407_v19 = vunpack.c.h.bf16 %v1433_v9  ;;  %v668_v8 = vmul.f32 %v1406_v29, %v1701_v6 }
 0x13e   :  { %v894_v60 = vmax.f32 %v878_v33, 0.0  ;;  %v616_v41 = vadd.f32 %v600_v12, %v460_v62  ;;  %v704_v50 = vmul.f32 %v1406_v29, %v1710_v16  ;;  %v740_v15 = vmul.f32 %v1406_v29, %v1736_v42 }
 0x13f   :  { %v579_v61 = vadd.f32 %v563_v22, %v423_v49  ;;  %v580_v59 = vadd.f32 %v564_v57, %v424_v11  ;;  %v669_v5 = vmul.f32 %v1407_v19, %v1701_v6  ;;  %v684_v44 = vadd.f32 %v668_v8, %v543_v37 }
 0x140   :  { %v909_v32 = vmin.f32 %v893_v7, 6.0  ;;  %v910_v38 = vmin.f32 %v894_v60, 6.0  ;;  %v741_v3 = vmul.f32 %v1407_v19, %v1736_v42  ;;  %v756_v34 = vadd.f32 %v740_v15, %v615_v39  ;;  %v1554_v60 = vld [vmem:[%s2133_s0 + $0x10] sm:$0xff]  }
 0x141   :  { %v685_v20 = vadd.f32 %v669_v5, %v544_v21  ;;  %v705_v45 = vmul.f32 %v1407_v19, %v1710_v16  ;;  %v774_v46 = vrot.slane %v684_v44, 7  ;;  %v720_v47 = vadd.f32 %v704_v50, %v579_v61  ;;  %v1553_v21 = vld [vmem:[%s2133_s0 + $0x18] sm:$0xff]  }
 0x142   :  { %v1288_v55 = vpack.c.bf16 %v910_v38, %v909_v32  ;;  %v757_v35 = vadd.f32 %v741_v3, %v616_v41  ;;  %v807_v48 = vrot.slane %v756_v34, 1  ;;  %v1147_v17 = vunpack.c.l.bf16 %v1551_v26 }
 0x143   :  { %v775_v51 = vrot.slane %v685_v20, 7  ;;  %v791_v52 = vsel %vm776_vm2, 0.0, %v774_v46  ;;  %v721_v6 = vadd.f32 %v705_v45, %v580_v59  ;;  %v1148_v29 = vunpack.c.h.bf16 %v1551_v26 }
 0x144   :  { %1505 = vmatprep.mubr.bf16.mxu1 %v1288_v55  ;;  %v808_v56 = vrot.slane %v757_v35, 1  ;;  %v840_v43 = vadd.f32 %v791_v52, %v720_v47  ;;  %v824_v27 = vsel %vm809_vm3, 0.0, %v807_v48  ;;  %v1151_v39 = vunpack.c.l.bf16 %v1553_v21  ;;  %v1555_v48 = vld [vmem:[%s2133_s0 + $0x28] sm:$0xff]  }
 0x145   :  { %v792_v42 = vsel %vm776_vm2, 0.0, %v775_v51  ;;  %v1149_v41 = vunpack.c.l.bf16 %v1554_v60  ;;  %v1152_v59 = vunpack.c.h.bf16 %v1553_v21  ;;  %v1150_v3 = vunpack.c.h.bf16 %v1554_v60 }
 0x146   :  { %v841_v16 = vadd.f32 %v792_v42, %v721_v6  ;;  %v856_v58 = vadd.f32 %v840_v43, %v824_v27  ;;  %v825_v63 = vsel %vm809_vm3, 0.0, %v808_v56  ;;  %v1155_v51 = vunpack.c.l.bf16 %v1555_v48  ;;  %v1556_v56 = vld [vmem:[%s2133_s0 + $0x20] sm:$0xff]  }
 0x147   :  { %v1153_v43 = vunpack.c.l.bf16 %v1556_v56 }
 0x148   :  { %v857_v1 = vadd.f32 %v841_v16, %v825_v63  ;;  %v879_v54 = vadd.f32 %v1778_v53, %v856_v58  ;;  %v1156_v58 = vunpack.c.h.bf16 %v1555_v48 }
 0x14a   :  { %v880_v0 = vadd.f32 %v1778_v53, %v857_v1  ;;  %v895_v2 = vmax.f32 %v879_v54, 0.0  ;;  %v1552_v53 = vld [vmem:[%s2133_s0] sm:$0xff]  }
 0x14b   :  { %v1145_v36 = vunpack.c.l.bf16 %v1552_v53  ;;  %v1146_v31 = vunpack.c.h.bf16 %v1552_v53  ;;  %v1557_v53 = vld [vmem:[%s2133_s0 + $0x38] sm:$0xff]  }
 0x14c   :  { %v896_v9 = vmax.f32 %v880_v0, 0.0  ;;  %v911_v10 = vmin.f32 %v895_v2, 6.0  ;;  %v1154_v2 = vunpack.c.h.bf16 %v1556_v56 }
 0x14e   :  { %v912_v13 = vmin.f32 %v896_v9, 6.0 }
 0x150   :  { %v1289_v40 = vpack.c.bf16 %v912_v13, %v911_v10 }
 0x152   :  { %1506 = vmatmul.mubr.bf16.gmra.mxu1 %v1289_v40 }
 0x1c4   :  { %v1495_v18 = vpop.f32.mrf.mxu0 }
 0x1c5   :  { %v1091_v23 = vadd.f32 %v1495_v18, %v2026_v28 }
 0x1c6   :  { %v1082_v24 = vpop.f32.mrf.mxu0 }
 0x1c7   :  { %v1163_v4 = vadd.f32 %v1147_v17, %v1091_v23  ;;  %v1083_v25 = vadd.f32 %v2026_v28, %v1082_v24 }
 0x1c8   :  { %v1496_v30 = vpop.f32.mrf.mxu0 }
 0x1c9   :  { %v1179_v49 = vpack.c.bf16 %v1163_v4, %v1163_v4  ;;  %v1161_v14 = vadd.f32 %v1145_v36, %v1083_v25  ;;  %v1094_v11 = vadd.f32 %v1496_v30, %v2026_v28  ;;  %v1159_v36 = vunpack.c.l.bf16 %v1557_v53  ;;  %v1558_v4 = vld [vmem:[%s2133_s0 + $0x30] sm:$0xff]  }
 0x1ca   :  { %v1085_v22 = vpop.f32.mrf.mxu0  ;;  %v1157_v25 = vunpack.c.l.bf16 %v1558_v4 }
 0x1cb   :  { %1196 = vst.msk [vmem:[%s2139_s7 + $0x8] sm:$0xf] %vm1193_vm4, %v1179_v49  ;;  %v1177_v57 = vpack.c.bf16 %v1161_v14, %v1161_v14  ;;  %v1164_v12 = vadd.f32 %v1148_v29, %v1094_v11  ;;  %v1086_v33 = vadd.f32 %v2026_v28, %v1085_v22  ;;  %v1160_v49 = vunpack.c.h.bf16 %v1557_v53 }
 0x1cd   :  { %1194 = vst.msk [vmem:[%s2139_s7] sm:$0xf] %vm1193_vm4, %v1177_v57  ;;  %v1180_v7 = vpack.c.bf16 %v1164_v12, %v1164_v12  ;;  %v1162_v62 = vadd.f32 %v1146_v31, %v1086_v33  ;;  %v1158_v12 = vunpack.c.h.bf16 %v1558_v4 }
 0x1cf   :  { %1197 = vst.msk [vmem:[%s2139_s7 + $0xc] sm:$0xf] %vm1193_vm4, %v1180_v7  ;;  %v1178_v37 = vpack.c.bf16 %v1162_v62, %v1162_v62 }
 0x1d1   :  { %1195 = vst.msk [vmem:[%s2139_s7 + $0x4] sm:$0xf] %vm1193_vm4, %v1178_v37 }
 0x1de   :  { %v1499_v19 = vpop.f32.mrf.mxu1 }
 0x1df   :  { %v1107_v8 = vadd.f32 %v1499_v19, %v2026_v28 }
 0x1e0   :  { %v1098_v50 = vpop.f32.mrf.mxu1 }
 0x1e1   :  { %v1167_v15 = vadd.f32 %v1151_v39, %v1107_v8  ;;  %v1099_v61 = vadd.f32 %v2026_v28, %v1098_v50 }
 0x1e2   :  { %v1500_v5 = vpop.f32.mrf.mxu1 }
 0x1e3   :  { %v1183_v44 = vpack.c.bf16 %v1167_v15, %v1167_v15  ;;  %v1165_v32 = vadd.f32 %v1149_v41, %v1099_v61  ;;  %v1110_v38 = vadd.f32 %v1500_v5, %v2026_v28 }
 0x1e4   :  { %v1101_v34 = vpop.f32.mrf.mxu1 }
 0x1e5   :  { %1200 = vst.msk [vmem:[%s2139_s7 + $0x18] sm:$0xf] %vm1193_vm4, %v1183_v44  ;;  %v1181_v20 = vpack.c.bf16 %v1165_v32, %v1165_v32  ;;  %v1168_v45 = vadd.f32 %v1152_v59, %v1110_v38  ;;  %v1102_v46 = vadd.f32 %v2026_v28, %v1101_v34 }
 0x1e7   :  { %1198 = vst.msk [vmem:[%s2139_s7 + $0x10] sm:$0xf] %vm1193_vm4, %v1181_v20  ;;  %v1184_v55 = vpack.c.bf16 %v1168_v45, %v1168_v45  ;;  %v1166_v47 = vadd.f32 %v1150_v3, %v1102_v46 }
 0x1e9   :  { %1201 = vst.msk [vmem:[%s2139_s7 + $0x1c] sm:$0xf] %vm1193_vm4, %v1184_v55  ;;  %v1182_v35 = vpack.c.bf16 %v1166_v47, %v1166_v47 }
 0x1eb   :  { %1199 = vst.msk [vmem:[%s2139_s7 + $0x14] sm:$0xf] %vm1193_vm4, %v1182_v35 }
 0x1f8   :  { %v1503_v52 = vpop.f32.mrf.mxu1 }
 0x1f9   :  { %v1123_v6 = vadd.f32 %v1503_v52, %v2026_v28 }
 0x1fa   :  { %v1114_v42 = vpop.f32.mrf.mxu1 }
 0x1fb   :  { %v1171_v27 = vadd.f32 %v1155_v51, %v1123_v6  ;;  %v1115_v16 = vadd.f32 %v2026_v28, %v1114_v42 }
 0x1fc   :  { %v1504_v63 = vpop.f32.mrf.mxu1 }
 0x1fd   :  { %v1187_v1 = vpack.c.bf16 %v1171_v27, %v1171_v27  ;;  %v1169_v54 = vadd.f32 %v1153_v43, %v1115_v16  ;;  %v1126_v0 = vadd.f32 %v1504_v63, %v2026_v28 }
 0x1fe   :  { %v1117_v9 = vpop.f32.mrf.mxu1 }
 0x1ff   :  { %1204 = vst.msk [vmem:[%s2139_s7 + $0x28] sm:$0xf] %vm1193_vm4, %v1187_v1  ;;  %v1185_v10 = vpack.c.bf16 %v1169_v54, %v1169_v54  ;;  %v1172_v13 = vadd.f32 %v1156_v58, %v1126_v0  ;;  %v1118_v40 = vadd.f32 %v2026_v28, %v1117_v9 }
 0x201   :  { %1202 = vst.msk [vmem:[%s2139_s7 + $0x20] sm:$0xf] %vm1193_vm4, %v1185_v10  ;;  %v1188_v26 = vpack.c.bf16 %v1172_v13, %v1172_v13  ;;  %v1170_v17 = vadd.f32 %v1154_v2, %v1118_v40 }
 0x203   :  { %1205 = vst.msk [vmem:[%s2139_s7 + $0x2c] sm:$0xf] %vm1193_vm4, %v1188_v26  ;;  %v1186_v18 = vpack.c.bf16 %v1170_v17, %v1170_v17 }
 0x205   :  { %1203 = vst.msk [vmem:[%s2139_s7 + $0x24] sm:$0xf] %vm1193_vm4, %v1186_v18 }
 0x212   :  { %v1507_v23 = vpop.f32.mrf.mxu1 }
 0x213   :  { %v1139_v24 = vadd.f32 %v1507_v23, %v2026_v28 }
 0x214   :  { %v1130_v29 = vpop.f32.mrf.mxu1 }
 0x215   :  { %v1175_v30 = vadd.f32 %v1159_v36, %v1139_v24  ;;  %v1131_v31 = vadd.f32 %v2026_v28, %v1130_v29 }
 0x216   :  { %v1508_v14 = vpop.f32.mrf.mxu1 }
 0x217   :  { %v1191_v11 = vpack.c.bf16 %v1175_v30, %v1175_v30  ;;  %v1173_v22 = vadd.f32 %v1157_v25, %v1131_v31  ;;  %v1142_v57 = vadd.f32 %v1508_v14, %v2026_v28 }
 0x218   :  { %v1133_v33 = vpop.f32.mrf.mxu1 }
 0x219   :  { %1208 = vst.msk [vmem:[%s2139_s7 + $0x38] sm:$0xf] %vm1193_vm4, %v1191_v11  ;;  %v1189_v7 = vpack.c.bf16 %v1173_v22, %v1173_v22  ;;  %v1176_v62 = vadd.f32 %v1160_v49, %v1142_v57  ;;  %v1134_v37 = vadd.f32 %v2026_v28, %v1133_v33 }
 0x21b   :  { %1206 = vst.msk [vmem:[%s2139_s7 + $0x30] sm:$0xf] %vm1193_vm4, %v1189_v7  ;;  %v1192_v21 = vpack.c.bf16 %v1176_v62, %v1176_v62  ;;  %v1174_v39 = vadd.f32 %v1158_v12, %v1134_v37 }
 0x21d   :  { %1209 = vst.msk [vmem:[%s2139_s7 + $0x3c] sm:$0xf] %vm1193_vm4, %v1192_v21  ;;  %v1190_v19 = vpack.c.bf16 %v1174_v39, %v1174_v39 }
 0x21f   :  { %1207 = vst.msk [vmem:[%s2139_s7 + $0x34] sm:$0xf] %vm1193_vm4, %v1190_v19 }

</bundles_post_ra>
